<compile_context>
chip_gen: v6e
topology: v6e:2x2x1
jax: 0.10.0
libtpu: 0.0.40
codegen_flags: <defaults>
</compile_context>

<pallas_src>
import functools
import itertools

import numpy as np

import jax
import jax.numpy as jnp
from jax import lax
from jax.experimental import pallas as pl
from jax.experimental.pallas import tpu as pltpu


def _round_up(x, m):
    return ((x + m - 1) // m) * m


# ----------------------------------------------------------------------------
# Kernel: one anchor block per grid step (Gram slice + sentinel hinge reduction)
# ----------------------------------------------------------------------------
def _hinge_block_kernel(x_ref, mod_r_ref, mod_c_ref, sq_r_ref, out_ref,
                        *, margin, a_blk, jt, n_j):
    # x_ref:     (Bp, Dp) f32  zero-padded latent codes (full array, resident)
    # mod_r_ref: (Bp, 1)  i32  modality id per sample (-1 = untracked / padding)
    # mod_c_ref: (1, Bp)  i32  same ids, lane-oriented copy
    # sq_r_ref:  (1, Bp)  f32  per-sample squared norms, lane-oriented
    # out_ref:   (8, 128) f32  this anchor block's partial hinge sum (replicated)
    Bp = x_ref.shape[0]
    a0 = pl.multiple_of(pl.program_id(0) * a_blk, a_blk)

    x_a = x_ref[pl.ds(a0, a_blk), :]                                    # (A, Dp)
    # Gram slice on the MXU: g[r, c] = <x_{a0+r}, x_c>  (single large-K contraction)
    g = lax.dot_general(x_a, x_ref[...], (((1,), (1,)), ((), ())),
                        preferred_element_type=jnp.float32)             # (A, Bp)
    sq_a = jnp.sum(x_a * x_a, axis=1, keepdims=True)                    # (A, 1)
    d = jnp.sqrt(jnp.maximum(sq_a + sq_r_ref[...] - 2.0 * g, 0.0))      # (A, Bp)

    mod_a = mod_r_ref[pl.ds(a0, a_blk), :]                              # (A, 1)
    mod_c = mod_c_ref[...]                                              # (1, Bp)
    valid = (mod_a >= 0) & (mod_c >= 0)
    same = mod_a == mod_c
    # diagonal exclusion (anchor == positive); global anchor index = a0 + row
    not_eye = (lax.broadcasted_iota(jnp.int32, (a_blk, Bp), 0) + a0
               ) != lax.broadcasted_iota(jnp.int32, (a_blk, Bp), 1)

    big = jnp.float32(1e30)
    # Sentinel-masked distances: relu(dpos - dneg) == masked hinge term.
    dpos = jnp.where(valid & same & not_eye, d + jnp.float32(margin), -big)  # (A, Bp)
    dneg = jnp.where(valid & jnp.logical_not(same), d, big)                  # (A, Bp)

    partial = jnp.float32(0.0)
    for c in range(n_j):   # static chunking of the positive axis (keeps temps in budget)
        dp = dpos[:, c * jt:(c + 1) * jt]                               # (A, jt)
        partial = partial + jnp.sum(
            jnp.maximum(dp[:, :, None] - dneg[:, None, :], 0.0))
    out_ref[...] = jnp.full(out_ref.shape, partial, jnp.float32)


@functools.partial(jax.jit, static_argnames=("margin",))
def latent_modality_loss(batch_codes, modality_ids, margin=0.003):
    """batch_codes: (B, D) float; modality_ids: (B,) int32, -1 = not a tracked modality."""
    B, D = batch_codes.shape
    ids = modality_ids.astype(jnp.int32)

    # ---- n_it (number of hinge terms): cheap O(B^2) mask math hoisted out of the kernel.
    valid = ids >= 0
    same = (ids[:, None] == ids[None, :]) & valid[:, None] & valid[None, :]
    pair = same & jnp.logical_not(jnp.eye(B, dtype=bool))   # ordered same-modality pairs
    imp = valid[:, None] & valid[None, :] & (ids[:, None] != ids[None, :])
    n_it = jnp.sum(jnp.sum(pair, axis=1) * jnp.sum(imp, axis=1)).astype(jnp.float32)

    # ---- static tiling decisions (shape-only, resolved at trace time).
    a_blk = 8                                     # sublane-aligned anchor block
    Bp = _round_up(max(B, a_blk), a_blk)
    Dp = _round_up(max(D, 128), 128)              # lane-dense latent dim for the MXU

    temp_budget = 16 * 1024 * 1024                # budget for live (a_blk, jt, Bp) f32 temps
    if 2 * a_blk * Bp * Bp * 4 <= temp_budget:
        jt = Bp
    else:
        jt = max(128, (temp_budget // (2 * a_blk * Bp * 4)) // 128 * 128)
        Bp = _round_up(Bp, jt)
    n_j = Bp // jt
    n_blocks = Bp // a_blk

    # VMEM limit derived from the actual footprint and the chip's capacity.
    needed = (2 * Bp * Dp * 4          # full x (assume double-buffered)
              + 2 * a_blk * jt * Bp * 4  # live 3-D hinge temps
              + 8 * a_blk * Bp * 4       # d / masks / dpos / dneg rows
              + (2 << 20))               # headroom
    try:
        phys = int(pltpu.get_tpu_info().vmem_capacity_bytes)
    except Exception:
        phys = 64 * 1024 * 1024          # v7x floor
    vmem_limit = int(min(max(needed, 32 * 1024 * 1024), int(phys * 0.75)))

    # ---- padded, layout-friendly operands.
    x = jnp.pad(batch_codes.astype(jnp.float32), ((0, Bp - B), (0, Dp - D)))
    ids_p = jnp.pad(ids, (0, Bp - B), constant_values=-1)
    mod_r = ids_p.reshape(Bp, 1)
    mod_c = ids_p.reshape(1, Bp)
    sq_r = jnp.sum(x * x, axis=1).reshape(1, Bp)

    out = pl.pallas_call(
        functools.partial(_hinge_block_kernel, margin=float(margin),
                          a_blk=a_blk, jt=jt, n_j=n_j),
        out_shape=jax.ShapeDtypeStruct((n_blocks * 8, 128), jnp.float32),
        grid_spec=pltpu.PrefetchScalarGridSpec(
            num_scalar_prefetch=0,
            grid=(n_blocks,),
            in_specs=[
                pl.BlockSpec((Bp, Dp), lambda i: (0, 0)),   # x, resident across the grid
                pl.BlockSpec((Bp, 1), lambda i: (0, 0)),    # modality ids (sublane copy)
                pl.BlockSpec((1, Bp), lambda i: (0, 0)),    # modality ids (lane copy)
                pl.BlockSpec((1, Bp), lambda i: (0, 0)),    # squared norms (lane copy)
            ],
            out_specs=pl.BlockSpec((8, 128), lambda i: (i, 0)),
        ),
        compiler_params=pltpu.CompilerParams(
            dimension_semantics=("parallel",),   # anchor blocks split across TCs on v7x
            vmem_limit_bytes=vmem_limit,
        ),
    )(x, mod_r, mod_c, sq_r)

    total = jnp.sum(out[::8, 0])                 # one (replicated) partial per anchor block
    # TODO(synk): the reference raises ZeroDivisionError when no valid triplet exists; we
    # return 0.0 instead (documented divergence).
    return jnp.where(n_it > 0, total / jnp.maximum(n_it, 1.0), jnp.float32(0.0))


# ----------------------------------------------------------------------------
# Module-like wrapper mirroring latentModalityLoss
# ----------------------------------------------------------------------------
class LatentModalityLoss:
    """Forward-only mirror of latentModalityLoss."""

    def __init__(self, latent_space_size, modalities, mu=0.5, margin=0.003):
        self.latent_space_size = latent_space_size
        self.modalities = list(modalities)
        self.mu = mu                      # unused in forward (parity with the reference)
        self.margin = float(margin)

    def __call__(self, batch_codes, modalities, epsilon=0.0001):
        # Host-side label -> integer-id mapping (same role as the reference's dict build).
        ids = jnp.asarray(
            [self.modalities.index(m) if m in self.modalities else -1 for m in modalities],
            jnp.int32)
        # TODO(synk): the reference's torch.tensor(..., requires_grad=True).cuda() plumbing
        # and the backward pass have no Pallas equivalent (pallas_call has no VJP; a
        # custom_vjp would be needed for training).
        return latent_modality_loss(batch_codes, ids, margin=self.margin)


# ----------------------------------------------------------------------------
# Pure-Python reference (mirrors the PyTorch loops exactly) for a self-check
# ----------------------------------------------------------------------------
def _reference_loss(codes, labels, modalities, margin):
    codes = np.asarray(codes, np.float64)
    mod_dict = {m: codes[[i for i, lab in enumerate(labels) if lab == m]] for m in modalities}

    def l2(a, b):
        return np.sqrt(np.sum((a - b) ** 2))

    loss, n_it = 0.0, 0
    for key, value in mod_dict.items():
        pairs = list(itertools.combinations(range(value.shape[0]), 2))
        for key_imp, value_imp in mod_dict.items():
            if key_imp == key:
                continue
            for imp in range(value_imp.shape[0]):
                for (p0, p1) in pairs:
                    dt = l2(value[p0], value[p1])
                    loss += max(dt - l2(value[p0], value_imp[imp]) + margin, 0)
                    loss += max(dt - l2(value[p1], value_imp[imp]) + margin, 0)
                    n_it += 2
    return loss / n_it


if __name__ == "__main__":
    key = jax.random.PRNGKey(0)

    B, LATENT = 12, 32   # Bp=16 -> 2 anchor blocks, exercises the parallel grid axis
    tracked = ["t1", "t2", "flair"]
    labels = ["t1", "t2", "flair", "t1", "t2", "flair",
              "t1", "other", "t2", "flair", "t1", "other"]   # "other" is dropped

    codes = jax.random.normal(key, (B, LATENT), jnp.float32)

    loss_mod = LatentModalityLoss(latent_space_size=LATENT, modalities=tracked,
                                  mu=0.5, margin=0.003)
    loss = loss_mod(codes, labels)
    loss = jax.block_until_ready(loss)

    ref = _reference_loss(np.asarray(codes), labels, tracked, 0.003)
    np.testing.assert_allclose(float(loss), ref, rtol=2e-3, atol=1e-5)
    assert loss.shape == () and bool(jnp.isfinite(loss))
    print("KERNEL_OK")
</pallas_src>

<mosaic_0001>
module attributes {stable_mosaic.version = 11 : i64} {
  func.func @_hinge_block_kernel(%arg0: i32, %arg1: memref<16x128xf32, #tpu.memory_space<vmem>>, %arg2: memref<16x1xi32, #tpu.memory_space<vmem>>, %arg3: memref<1x16xi32, #tpu.memory_space<vmem>>, %arg4: memref<1x16xf32, #tpu.memory_space<vmem>>, %arg5: memref<8x128xf32, #tpu.memory_space<vmem>>) attributes {dimension_semantics = [#tpu.dimension_semantics<parallel>], iteration_bounds = array<i64: 2>, scalar_prefetch = 0 : i64, scratch_operands = 0 : i64, tpu.core_type = #tpu.core_type<tc>, window_params = [{pipeline_mode = #tpu.pipeline_mode<synchronous>, transform_indices = @transform_0, window_bounds = array<i64: 16, 128>}, {pipeline_mode = #tpu.pipeline_mode<synchronous>, transform_indices = @transform_1, window_bounds = array<i64: 16, 1>}, {pipeline_mode = #tpu.pipeline_mode<synchronous>, transform_indices = @transform_2, window_bounds = array<i64: 1, 16>}, {pipeline_mode = #tpu.pipeline_mode<synchronous>, transform_indices = @transform_3, window_bounds = array<i64: 1, 16>}, {transform_indices = @transform_4, window_bounds = array<i64: 8, 128>}]} {
    %c8_i32 = arith.constant 8 : i32
    %0 = arith.muli %arg0, %c8_i32 : i32
    %1 = tpu.assume_multiple %0, 8 : i32
    %2 = arith.index_cast %1 : i32 to index
    %c0 = arith.constant 0 : index
    %3 = vector.load %arg1[%2, %c0] : memref<16x128xf32, #tpu.memory_space<vmem>>, vector<8x128xf32>
    %c0_0 = arith.constant 0 : index
    %c0_1 = arith.constant 0 : index
    %4 = vector.load %arg1[%c0_0, %c0_1] : memref<16x128xf32, #tpu.memory_space<vmem>>, vector<16x128xf32>
    %cst = arith.constant dense<0.000000e+00> : vector<8x16xf32>
    %5 = tpu.matmul %3, %4, %cst {dimension_numbers = #tpu.dot_dimension_numbers<[1], [1], [0], [0], [0, 0, 1, 0], [], []>} : vector<8x128xf32>, vector<16x128xf32>, vector<8x16xf32> -> vector<8x16xf32>
    %6 = arith.mulf %3, %3 : vector<8x128xf32>
    %cst_2 = arith.constant dense<0.000000e+00> : vector<8xf32>
    %7 = vector.multi_reduction <add>, %6, %cst_2 [1] : vector<8x128xf32> to vector<8xf32>
    %8 = vector.shape_cast %7 : vector<8xf32> to vector<8x1xf32>
    %c0_3 = arith.constant 0 : index
    %c0_4 = arith.constant 0 : index
    %9 = vector.load %arg4[%c0_3, %c0_4] : memref<1x16xf32, #tpu.memory_space<vmem>>, vector<1x16xf32>
    %10 = vector.broadcast %8 : vector<8x1xf32> to vector<8x16xf32>
    %11 = vector.broadcast %9 : vector<1x16xf32> to vector<8x16xf32>
    %12 = arith.addf %10, %11 : vector<8x16xf32>
    %cst_5 = arith.constant 2.000000e+00 : f32
    %13 = vector.broadcast %cst_5 : f32 to vector<8x16xf32>
    %14 = arith.mulf %13, %5 : vector<8x16xf32>
    %15 = arith.subf %12, %14 : vector<8x16xf32>
    %cst_6 = arith.constant 0.000000e+00 : f32
    %16 = vector.broadcast %cst_6 : f32 to vector<8x16xf32>
    %17 = arith.maximumf %15, %16 : vector<8x16xf32>
    %18 = math.sqrt %17 : vector<8x16xf32>
    %19 = arith.index_cast %1 : i32 to index
    %c0_7 = arith.constant 0 : index
    %20 = vector.load %arg2[%19, %c0_7] : memref<16x1xi32, #tpu.memory_space<vmem>>, vector<8x1xi32>
    %c0_8 = arith.constant 0 : index
    %c0_9 = arith.constant 0 : index
    %21 = vector.load %arg3[%c0_8, %c0_9] : memref<1x16xi32, #tpu.memory_space<vmem>>, vector<1x16xi32>
    %c0_i32 = arith.constant 0 : i32
    %22 = vector.broadcast %c0_i32 : i32 to vector<8x1xi32>
    %23 = arith.cmpi sge, %20, %22 : vector<8x1xi32>
    %c0_i32_10 = arith.constant 0 : i32
    %24 = vector.broadcast %c0_i32_10 : i32 to vector<1x16xi32>
    %25 = arith.cmpi sge, %21, %24 : vector<1x16xi32>
    %26 = vector.broadcast %23 : vector<8x1xi1> to vector<8x16xi1>
    %27 = vector.broadcast %25 : vector<1x16xi1> to vector<8x16xi1>
    %28 = arith.andi %26, %27 : vector<8x16xi1>
    %29 = vector.broadcast %20 : vector<8x1xi32> to vector<8x16xi32>
    %30 = vector.broadcast %21 : vector<1x16xi32> to vector<8x16xi32>
    %31 = arith.cmpi eq, %29, %30 : vector<8x16xi32>
    %32 = tpu.iota {dimensions = array<i32: 0>} : vector<8x16xi32>
    %33 = vector.broadcast %1 : i32 to vector<8x16xi32>
    %34 = arith.addi %32, %33 : vector<8x16xi32>
    %35 = tpu.iota {dimensions = array<i32: 1>} : vector<8x16xi32>
    %36 = arith.cmpi ne, %34, %35 : vector<8x16xi32>
    %37 = arith.andi %28, %31 : vector<8x16xi1>
    %38 = arith.andi %37, %36 : vector<8x16xi1>
    %cst_11 = arith.constant 3.000000e-03 : f32
    %39 = vector.broadcast %cst_11 : f32 to vector<8x16xf32>
    %40 = arith.addf %18, %39 : vector<8x16xf32>
    %cst_12 = arith.constant 0.000000e+00 : f32
    %cst_13 = arith.constant 1.000000e+30 : f32
    %41 = arith.subf %cst_12, %cst_13 : f32
    %42 = vector.broadcast %41 : f32 to vector<8x16xf32>
    %43 = arith.select %38, %40, %42 : vector<8x16xi1>, vector<8x16xf32>
    %cst_14 = arith.constant dense<true> : vector<8x16xi1>
    %44 = arith.xori %31, %cst_14 : vector<8x16xi1>
    %45 = arith.andi %28, %44 : vector<8x16xi1>
    %cst_15 = arith.constant 1.000000e+30 : f32
    %46 = vector.broadcast %cst_15 : f32 to vector<8x16xf32>
    %47 = arith.select %45, %18, %46 : vector<8x16xi1>, vector<8x16xf32>
    %48 = vector.shape_cast %43 : vector<8x16xf32> to vector<8x16x1xf32>
    %49 = vector.shape_cast %47 : vector<8x16xf32> to vector<8x1x16xf32>
    %50 = vector.broadcast %48 : vector<8x16x1xf32> to vector<8x16x16xf32>
    %51 = vector.broadcast %49 : vector<8x1x16xf32> to vector<8x16x16xf32>
    %52 = arith.subf %50, %51 : vector<8x16x16xf32>
    %cst_16 = arith.constant 0.000000e+00 : f32
    %53 = vector.broadcast %cst_16 : f32 to vector<8x16x16xf32>
    %54 = arith.maximumf %52, %53 : vector<8x16x16xf32>
    %55 = vector.shape_cast %54 : vector<8x16x16xf32> to vector<1x8x16x16xf32>
    %cst_17 = arith.constant dense<0.000000e+00> : vector<1xf32>
    %56 = vector.multi_reduction <add>, %55, %cst_17 [1, 2, 3] : vector<1x8x16x16xf32> to vector<1xf32>
    %57 = vector.shape_cast %56 : vector<1xf32> to vector<1x1x1x1xf32>
    %58 = vector.extract %57[0, 0, 0, 0] : f32 from vector<1x1x1x1xf32>
    %cst_18 = arith.constant 0.000000e+00 : f32
    %59 = arith.addf %cst_18, %58 : f32
    %60 = vector.broadcast %59 : f32 to vector<8x128xf32>
    %c0_19 = arith.constant 0 : index
    %c0_20 = arith.constant 0 : index
    %61 = vector.load %arg5[%c0_19, %c0_20] : memref<8x128xf32, #tpu.memory_space<vmem>>, vector<8x128xf32>
    tpu.vector_store %arg5[%c0_19, %c0_20], %60 {strides = array<i32>} : memref<8x128xf32, #tpu.memory_space<vmem>>, vector<8x128xf32>,
    return
  }
  func.func @transform_0(%arg0: i32) -> (i32, i32) {
    %c0_i32 = arith.constant 0 : i32
    %c0_i32_0 = arith.constant 0 : i32
    %c0_i32_1 = arith.constant 0 : i32
    return %c0_i32, %c0_i32_0 : i32, i32
  }
  func.func @transform_1(%arg0: i32) -> (i32, i32) {
    %c0_i32 = arith.constant 0 : i32
    %c0_i32_0 = arith.constant 0 : i32
    %c0_i32_1 = arith.constant 0 : i32
    return %c0_i32, %c0_i32_0 : i32, i32
  }
  func.func @transform_2(%arg0: i32) -> (i32, i32) {
    %c0_i32 = arith.constant 0 : i32
    %c0_i32_0 = arith.constant 0 : i32
    %c0_i32_1 = arith.constant 0 : i32
    return %c0_i32, %c0_i32_0 : i32, i32
  }
  func.func @transform_3(%arg0: i32) -> (i32, i32) {
    %c0_i32 = arith.constant 0 : i32
    %c0_i32_0 = arith.constant 0 : i32
    %c0_i32_1 = arith.constant 0 : i32
    return %c0_i32, %c0_i32_0 : i32, i32
  }
  func.func @transform_4(%arg0: i32) -> (i32, i32) {
    %c0_i32 = arith.constant 0 : i32
    %c0_i32_0 = arith.constant 0 : i32
    return %arg0, %c0_i32 : i32, i32
  }
}

</mosaic_0001>

<bundles_post_ra>
// kernel: latent_modality_loss.1
= control target key start
LH: loop header
LB: loop body
LE: loop exit
PB: predicated region body
PF: predicated region fallthrough
CT: control target
= control target key end

     0   :  { %s686_s15 = smov 0   ;;  %s806_s0 = inlined_call_operand.vmem [shape: f32[16,128], index: 0, kind: input, shape index: {}]   ;;  %s807_s1 = inlined_call_operand.vmem [shape: s32[16,1], index: 1, kind: input, shape index: {}]   ;;  %s808_s2 = inlined_call_operand.vmem [shape: s32[1,16], index: 2, kind: input, shape index: {}]   ;;  %s809_s3 = inlined_call_operand.vmem [shape: f32[1,16], index: 3, kind: input, shape index: {}]   ;;  %s810_s4 = inlined_call_operand.vmem [shape: f32[16,128], index: 4, kind: output, shape index: {}]  }
   0x1 LB: > { %s692_s16 = sadd.s32 4294967295, %s654_s15   ;;  %p613_p0 = scmp.ge.s32.totalorder %s654_s15, 1  ;;  %s654_s15 = sphi %s686_s15, %s14_s15  }
   0x2   : > { %p152_p1 = scmp.lt.s32.totalorder %s654_s15, 3 }
   0x4   : > { %p153_p2 = pnand %p613_p0, %p152_p1 }
   0x5   : > { %s700_s19 = sshll.u32 (!%p153_p2), %s692_s16, 3  ;;  %p172_p3 = scmp.lt.s32.totalorder (!%p153_p2), %s692_s16, 1 }
   0x6   : > { %156 = sbr.rel (%p153_p2) target bundleno = 616 (0x268), region = 36  ;;  %s177_s22 = scalar_lea.vmem (!%p153_p2), %s806_s0, %s700_s19 }
   0x7   : > { %s272_s25 = scalar_lea.vmem (!%p153_p2), %s807_s1, %s700_s19 }
   0xb   : > { %v180_v0 = vld [vmem:[%s806_s0 + $0x8] sm:$0xff]  ;;  %v656_v1 = vmov 0.0   ;;  %vm657_vm0 = vmmov 0   ;;  %v178_v2 = vld [vmem:[%s177_s22] sm:$0xff]  ;;  %v658_v3 = vmov 0   ;;  %v283_v8 = vlaneseq  ;;  %s818_s16 = smov (!%p172_p3, %s692_s16), 1 }
   0xc   : > { %622 = vmatprep.subr.mxu0 %v656_v1  ;;  %626 = vmatprep.mubr.msk.f32.mxu0 %vm657_vm0, %v656_v1  ;;  %v179_v4 = vld [vmem:[%s806_s0] sm:$0xff]  ;;  %v251_v5 = vmul.f32 %v178_v2, %v178_v2  ;;  %vm659_vm5 = vmmov 1   ;;  %v299_v28 = vstv %s700_s19  ;;  %v660_v29 = vmov 1966171168   ;;  %s614_s6 = sshll.u32 %s818_s16, 3 }
   0xd   : > { %623 = vmatpush3.xpose.msra.mxu0 %v180_v0  ;;  %645 = vset.pattern.permute.xlu1 %v658_v3  ;;  %v273_v6 = vld [vmem:[%s272_s25] sm:$0xff]  ;;  %v716_v10 = vshrl.u32 %v283_v8, 7  ;;  %v402_v30 = vunpack.c.l.s4 %v660_v29  ;;  %v302_v32 = vand.u32 127, %v283_v8  ;;  %vm521_vm15 = vcmask 130048   ;;  %s175_s9 = scalar_lea.vmem %s810_s4, %s614_s6 }
   0xe   : > { %624 = vmatprep.subr.mxu0 %v656_v1  ;;  %644 = vset.pattern.permute.xlu0 %v658_v3  ;;  %vm275_vm1 = vcmp.ge.s32.totalorder %v273_v6, 0  ;;  %v274_v9 = vld [vmem:[%s808_s2] sm:$0x1] }
   0xf   : > { %290 = vperm.xlu1 %645, %v273_v6   ;;  %252 = vadd.xlane.f32.xlu0 %v251_v5  ;;  %v277_v7 = vsel %vm275_vm1, 1, %v658_v3  ;;  %vm276_vm2 = vcmp.ge.s32.totalorder %v274_v9, 0  ;;  %v719_v11 = vsub.s32 0, %v716_v10  ;;  %v616_v21 = vld [vmem:[%s809_s3] ss:$0 sm:$0xff]  ;;  %v300_v31 = vadd.s32 %v299_v28, %v716_v10 }
  0x10   : > { %v282_v12 = vsel %vm276_vm2, 1, %v658_v3  ;;  %v403_v33 = vunpack.c.0.s8 %v402_v30  ;;  %v368_v40 = vsub.s32 5, %v716_v10  ;;  %v379_v49 = vsub.s32 6, %v716_v10 }
  0x11   : > { %625 = vmatpush3.xpose.msra.mxu0 %v179_v4  ;;  %v295_v13 = vrot.slane %v274_v9, %v719_v11  ;;  %v286_v15 = vrot.slane %v282_v12, %v719_v11  ;;  %vm303_vm10 = vcmp.ne.s32.totalorder %v300_v31, %v302_v32  ;;  %v390_v55 = vsub.s32 7, %v716_v10 }
  0x12   : > { %v406_v36 = vsub.s32 %v403_v33, %v716_v10  ;;  %v324_v56 = vsub.s32 1, %v716_v10  ;;  %v335_v61 = vsub.s32 2, %v716_v10  ;;  %v346_v63 = vsub.s32 3, %v716_v10 }
  0x13   : > { %vm287_vm4 = vcmp.eq.s32.totalorder %v286_v15, 1  ;;  %v357_v1 = vsub.s32 4, %v716_v10 }
  0x14   : > { %627 = vmatmul.mubr.f32.vlgmr.msra.gmra.mxu0 %v178_v2 }
  0x25   : > { %279 = vperm.xlu0 %644, %v277_v7  }
  0x8a   : > { %v291_v14 = vpop.permute.xlu1 %290 }
  0x8b   : > { %vm723_vm3 = vcmp.eq.s32.totalorder %v291_v14, %v295_v13 }
  0x8c   : > { %vm729_vm6 = vmxor %vm723_vm3, %vm659_vm5 }
  0x98   : > { %v253_v16 = vpop.xlane.xlu0 %252 }
  0x99   : > { %v261_v22 = vadd.f32 %v616_v21, %v253_v16 }
  0xa0   : > { %v280_v18 = vpop.permute.xlu0 %279 }
  0xa1   : > { %vm281_vm7 = vcmp.eq.s32.totalorder %v280_v18, 1 }
  0xa2   : > { %vm733_vm8 = vmand %vm281_vm7, %vm287_vm4 }
  0xa3   : > { %vm309_vm9 = vmand %vm733_vm8, %vm729_vm6 }
  0xa4   : > { %vm304_vm11 = vmand %vm733_vm8, %vm723_vm3 }
  0xa5   : > { %vm305_vm14 = vmand %vm304_vm11, %vm303_vm10 }
  0xd4   : > { %v247_v23 = vpop.f32.mrf.mxu0 }
  0xd5   : > { %v262_v24 = vmul.f32 2.0, %v247_v23 }
  0xd6   : > { %v628_v25 = vpop.f32.mrf.mxu0 }
  0xd7   : > { %v263_v26 = vsub.f32 %v261_v22, %v262_v24 }
  0xd9   : > { %v264_v27 = vmax.f32 %v263_v26, 0.0 }
  0xdb   : > { %646 = vrsqrt.f32 %v264_v27  ;;  %vm267_vm12 = vcmp.eq.f32.partialorder %v264_v27, inf  ;;  %v270_v37 = vand.u32 2147483648, %v264_v27  ;;  %vm269_vm13 = vcmp.eq.f32.partialorder %v264_v27, 0.0 }
  0xe8   : > { %v647_v34 = vpop.eup %646 }
  0xe9   : > { %v266_v35 = vmul.f32 %v647_v34, %v264_v27 }
  0xeb   : > { %v268_v38 = vsel %vm267_vm12, %v264_v27, %v266_v35 }
  0xec   : > { %v271_v39 = vsel %vm269_vm13, %v270_v37, %v268_v38 }
  0xed   : > { %v306_v41 = vadd.f32 0.003, %v271_v39  ;;  %v310_v42 = vsel %vm309_vm9, %v271_v39, 1e+30 }
  0xee   : > { %v400_v43 = vcombine.high %v310_v42, %v310_v42  ;;  %v407_v44 = vrot.slane %v310_v42, %v406_v36 }
  0xef   : > { %v307_v45 = vsel %vm305_vm14, %v306_v41, -1e+30 }
  0xf0   : > { %v414_v46 = vrot.slane %v400_v43, %v406_v36  ;;  %v369_v47 = vrot.slane %v307_v45, %v368_v40  ;;  %v314_v48 = vrot.slane %v307_v45, %v719_v11  ;;  %v423_v51 = vrot.slane %v407_v44, %v406_v36 }
  0xf1   : > { %v415_v53 = vcombine.high %v407_v44, %v407_v44  ;;  %v380_v54 = vrot.slane %v307_v45, %v379_v49  ;;  %v391_v59 = vrot.slane %v307_v45, %v390_v55  ;;  %v325_v60 = vrot.slane %v307_v45, %v324_v56 }
  0xf2   : > { %375 = vbcast.lane.b32.xlu0 %v369_v47, 264  ;;  %316 = vbcast.lane.b32.xlu1 %v314_v48, 256  ;;  %v416_v50 = vcombine.high %v414_v46, %v414_v46  ;;  %v759_v52 = vrot.slane %v414_v46, %v406_v36  ;;  %v336_v62 = vrot.slane %v307_v45, %v335_v61 }
  0xf3   : > { %v437_v58 = vrot.slane %v415_v53, %v406_v36  ;;  %v347_v0 = vrot.slane %v307_v45, %v346_v63  ;;  %v358_v2 = vrot.slane %v307_v45, %v357_v1  ;;  %v452_v4 = vrot.slane %v423_v51, %v719_v11 }
  0xf4   : > { %v763_v57 = vrot.slane %v416_v50, %v406_v36  ;;  %v445_v17 = vcombine.high %v423_v51, %v423_v51 }
  0xf5   : > { %v456_v12 = vrot.slane %v437_v58, %v719_v11  ;;  %v447_v30 = vcombine.high %v437_v58, %v437_v58  ;;  %v446_v58 = vcombine.high %v759_v52, %v759_v52 }
  0xf6   : > { %386 = vbcast.lane.b32.xlu0 %v380_v54, 264  ;;  %320 = vbcast.lane.b32.xlu1 %v314_v48, 264  ;;  %v460_v24 = vrot.slane %v445_v17, %v719_v11  ;;  %v472_v56 = vrot.slane %v763_v57, %v719_v11 }
  0xf7   : > { %v464_v36 = vrot.slane %v447_v30, %v719_v11 }
  0xfa   : > { %397 = vbcast.lane.b32.xlu0 %v391_v59, 264  ;;  %327 = vbcast.lane.b32.xlu1 %v325_v60, 256 }
  0xfe   : > { %331 = vbcast.lane.b32.xlu1 %v325_v60, 264 }
 0x102   : > { %338 = vbcast.lane.b32.xlu1 %v336_v62, 256 }
 0x106   : > { %342 = vbcast.lane.b32.xlu1 %v336_v62, 264 }
 0x10a   : > { %349 = vbcast.lane.b32.xlu1 %v347_v0, 256 }
 0x10e   : > { %353 = vbcast.lane.b32.xlu1 %v347_v0, 264 }
 0x112   : > { %360 = vbcast.lane.b32.xlu1 %v358_v2, 256 }
 0x116   : > { %364 = vbcast.lane.b32.xlu1 %v358_v2, 264  ;;  %v476_v2 = vrot.slane %v446_v58, %v719_v11 }
 0x11a   : > { %371 = vbcast.lane.b32.xlu1 %v369_v47, 256  ;;  %v468_v47 = vrot.slane %v759_v52, %v719_v11 }
 0x11e   : > { %382 = vbcast.lane.b32.xlu1 %v380_v54, 256 }
 0x122   : > { %393 = vbcast.lane.b32.xlu1 %v391_v59, 256 }
 0x164   : > { %v317_v3 = vpop.permute.xlu1 %316  ;;  %v376_v48 = vpop.permute.xlu0 %375 }
 0x165   : > { %v489_v5 = vsub.f32 %v317_v3, %v452_v4  ;;  %v500_v63 = vsub.f32 %v376_v48, %v472_v56  ;;  %v448_v3 = vcombine.high %v763_v57, %v763_v57 }
 0x167   : > { %v505_v8 = vmax.f32 %v489_v5, 0.0 }
 0x168   : > { %v321_v6 = vpop.permute.xlu1 %320  ;;  %v387_v61 = vpop.permute.xlu0 %386 }
 0x169   : > { %v490_v7 = vsub.f32 %v321_v6, %v452_v4  ;;  %v522_v15 = vsel %vm521_vm15, %v505_v8, 0.0  ;;  %v502_v8 = vsub.f32 %v387_v61, %v476_v2 }
 0x16b   : > { %v506_v9 = vmax.f32 %v490_v7, 0.0  ;;  %v516_v7 = vmax.f32 %v500_v63, 0.0  ;;  %v518_v17 = vmax.f32 %v502_v8, 0.0 }
 0x16c   : > { %v328_v13 = vpop.permute.xlu1 %327 }
 0x16d   : > { %v523_v10 = vsel %vm521_vm15, %v506_v9, 0.0  ;;  %v491_v14 = vsub.f32 %v328_v13, %v456_v12  ;;  %v398_v9 = vpop.permute.xlu0 %397  ;;  %v480_v13 = vrot.slane %v448_v3, %v719_v11 }
 0x16e   : > { %v524_v18 = vadd.f32 %v523_v10, %v522_v15 }
 0x16f   : > { %v507_v16 = vmax.f32 %v491_v14, 0.0 }
 0x170   : > { %v332_v19 = vpop.permute.xlu1 %331 }
 0x171   : > { %v525_v20 = vsel %vm521_vm15, %v507_v16, 0.0  ;;  %v492_v21 = vsub.f32 %v332_v19, %v456_v12  ;;  %v543_v16 = vsel %vm521_vm15, %v516_v7, 0.0 }
 0x172   : > { %v526_v22 = vadd.f32 %v525_v20, %v524_v18  ;;  %v504_v18 = vsub.f32 %v398_v9, %v480_v13 }
 0x173   : > { %v508_v23 = vmax.f32 %v492_v21, 0.0 }
 0x174   : > { %v339_v25 = vpop.permute.xlu1 %338 }
 0x175   : > { %v527_v26 = vsel %vm521_vm15, %v508_v23, 0.0  ;;  %v493_v27 = vsub.f32 %v339_v25, %v460_v24  ;;  %v520_v25 = vmax.f32 %v504_v18, 0.0 }
 0x176   : > { %v528_v28 = vadd.f32 %v527_v26, %v526_v22 }
 0x177   : > { %v509_v29 = vmax.f32 %v493_v27, 0.0 }
 0x178   : > { %v343_v31 = vpop.permute.xlu1 %342 }
 0x179   : > { %v529_v32 = vsel %vm521_vm15, %v509_v29, 0.0  ;;  %v494_v33 = vsub.f32 %v343_v31, %v460_v24  ;;  %v547_v24 = vsel %vm521_vm15, %v518_v17, 0.0  ;;  %v551_v29 = vsel %vm521_vm15, %v520_v25, 0.0 }
 0x17a   : > { %v530_v34 = vadd.f32 %v529_v32, %v528_v28 }
 0x17b   : > { %v510_v35 = vmax.f32 %v494_v33, 0.0 }
 0x17c   : > { %v350_v37 = vpop.permute.xlu1 %349 }
 0x17d   : > { %v531_v38 = vsel %vm521_vm15, %v510_v35, 0.0  ;;  %v495_v39 = vsub.f32 %v350_v37, %v464_v36 }
 0x17e   : > { %v532_v40 = vadd.f32 %v531_v38, %v530_v34 }
 0x17f   : > { %v511_v41 = vmax.f32 %v495_v39, 0.0 }
 0x180   : > { %v354_v42 = vpop.permute.xlu1 %353 }
 0x181   : > { %v533_v43 = vsel %vm521_vm15, %v511_v41, 0.0  ;;  %v496_v44 = vsub.f32 %v354_v42, %v464_v36 }
 0x182   : > { %v534_v45 = vadd.f32 %v533_v43, %v532_v40 }
 0x183   : > { %v512_v46 = vmax.f32 %v496_v44, 0.0 }
 0x184   : > { %v361_v49 = vpop.permute.xlu1 %360 }
 0x185   : > { %v535_v50 = vsel %vm521_vm15, %v512_v46, 0.0  ;;  %v497_v51 = vsub.f32 %v361_v49, %v468_v47 }
 0x186   : > { %v536_v53 = vadd.f32 %v535_v50, %v534_v45 }
 0x187   : > { %v513_v54 = vmax.f32 %v497_v51, 0.0 }
 0x188   : > { %v365_v55 = vpop.permute.xlu1 %364 }
 0x189   : > { %v537_v59 = vsel %vm521_vm15, %v513_v54, 0.0  ;;  %v498_v60 = vsub.f32 %v365_v55, %v468_v47 }
 0x18a   : > { %v538_v62 = vadd.f32 %v537_v59, %v536_v53 }
 0x18b   : > { %v514_v0 = vmax.f32 %v498_v60, 0.0 }
 0x18c   : > { %v372_v1 = vpop.permute.xlu1 %371 }
 0x18d   : > { %v539_v4 = vsel %vm521_vm15, %v514_v0, 0.0  ;;  %v499_v5 = vsub.f32 %v372_v1, %v472_v56 }
 0x18e   : > { %v540_v6 = vadd.f32 %v539_v4, %v538_v62 }
 0x18f   : > { %v515_v52 = vmax.f32 %v499_v5, 0.0 }
 0x190   : > { %v383_v12 = vpop.permute.xlu1 %382 }
 0x191   : > { %v541_v10 = vsel %vm521_vm15, %v515_v52, 0.0  ;;  %v501_v14 = vsub.f32 %v383_v12, %v476_v2 }
 0x192   : > { %v542_v15 = vadd.f32 %v541_v10, %v540_v6 }
 0x193   : > { %v517_v57 = vmax.f32 %v501_v14, 0.0 }
 0x194   : > { %v544_v19 = vadd.f32 %v543_v16, %v542_v15  ;;  %v394_v20 = vpop.permute.xlu1 %393 }
 0x195   : > { %v545_v21 = vsel %vm521_vm15, %v517_v57, 0.0  ;;  %v503_v22 = vsub.f32 %v394_v20, %v480_v13 }
 0x196   : > { %v546_v23 = vadd.f32 %v545_v21, %v544_v19 }
 0x197   : > { %v519_v11 = vmax.f32 %v503_v22, 0.0 }
 0x198   : > { %v548_v26 = vadd.f32 %v547_v24, %v546_v23 }
 0x199   : > { %v549_v27 = vsel %vm521_vm15, %v519_v11, 0.0 }
 0x19a   : > { %v550_v28 = vadd.f32 %v549_v27, %v548_v26 }
 0x19c   : > { %v552_v30 = vadd.f32 %v551_v29, %v550_v28 }
 0x19e   : > { %553 = vadd.xlane.f32.xlu1 %v552_v30 }
 0x227   : > { %v554_v31 = vpop.xlane.xlu1 %553 }
 0x228   : > { %v555_v32 = vrot.slane %v554_v31, 4 }
 0x22a   : > { %v556_v33 = vadd.f32 %v555_v32, %v554_v31 }
 0x22c   : > { %v557_v34 = vrot.slane %v556_v33, 2 }
 0x22e   : > { %v558_v35 = vadd.f32 %v557_v34, %v556_v33 }
 0x230   : > { %v559_v36 = vrot.slane %v558_v35, 1 }
 0x232   : > { %v560_v37 = vadd.f32 %v559_v36, %v558_v35 }
 0x234   : > { %629 = vpush %v560_v37 }
 0x265   : > { %s630_s10 = spop %629 }
 0x266   : > { %v563_v38 = vstv %s630_s10 }
 0x267   : > { %564 = vst [vmem:[%s175_s9] sm:$0xff] %v563_v38 }
 0x268 PF: > { %s14_s15 = sadd.s32 1, %s654_s15  }
 0x269   : > { %p11_p4 = scmp.ge.s32.totalorder %s14_s15, 4  }
 0x26b   :  { %13 = sbr.rel (!%p11_p4) target bundleno = 1 (0x1), region = 65 }

</bundles_post_ra>
